<compile_context>
chip_gen: v7x
topology: tpu7x:2x2x1
jax: 0.10.0
libtpu: 0.0.40
codegen_flags: <defaults>
</compile_context>

<pallas_src>
import functools

import jax
import jax.numpy as jnp
from jax.experimental import pallas as pl
from jax.experimental.pallas import tpu as pltpu

H = 256          # hidden width of the module
MID_W = 640      # fused (d1 | a1 | r1 | pad) width, multiple of 128
OUT_W = 128      # packed (ns | r | a | pad) width, single 128-lane segment
SLAB_W = H + OUT_W  # 384: one lane-dense output slab per batch tile


def _round_up(x, m):
    return ((x + m - 1) // m) * m


# --------------------------------------------------------------------------
# Kernel
# --------------------------------------------------------------------------
def encoder_decoder_kernel(
    state_ref,            # [bm, S]           f32
    action_ref,           # [bm, A]           f32
    e1ws_ref,             # [S, H]            bf16
    e1wa_ref,             # [A, H]            bf16
    e1b_ref,              # [1, H]            f32
    e2w_ref,              # [H, H]            bf16
    e2b_ref,              # [1, H]            f32
    wmid_ref,             # [H, MID_W]        bf16   (d1 | a1 | r1 | 0)
    bmid_ref,             # [1, MID_W]        f32    (d1b | a1b | 0)
    wout_ref,             # [MID_W, OUT_W]    bf16   block-diag d2 / a2 / r-passthrough
    bout_ref,             # [1, OUT_W]        f32    (d2b | 0 | a2b | 0)
    out_ref,              # [bm, SLAB_W]      f32    ([0:256]=l, [256:384]=ns|r|a)
):
    bf16 = jnp.bfloat16
    f32 = jnp.float32

    s = state_ref[...].astype(bf16)
    act = action_ref[...].astype(bf16)

    # l = relu(e1(cat(state, action)))  ==  relu(state @ Ws + action @ Wa + b1)
    h1 = (jnp.dot(s, e1ws_ref[...], preferred_element_type=f32)
          + jnp.dot(act, e1wa_ref[...], preferred_element_type=f32)
          + e1b_ref[...])
    h1 = jnp.maximum(h1, 0.0)

    # l = relu(e2(l))
    l = jnp.dot(h1.astype(bf16), e2w_ref[...], preferred_element_type=f32) + e2b_ref[...]
    l = jnp.maximum(l, 0.0)

    # Fused second stage: [d | da | r] = l @ [d1 | a1 | r1] + [d1b | a1b | 0]
    h2 = jnp.dot(l.astype(bf16), wmid_ref[...], preferred_element_type=f32) + bmid_ref[...]
    # ReLU only on the d / da segments (cols < 512); r (col 512) passes through.
    col = jax.lax.broadcasted_iota(jnp.int32, h2.shape, 1)
    h2 = jnp.where(col < 2 * H, jnp.maximum(h2, 0.0), h2)

    # Fused third stage: one block-diagonal matmul emits the packed [ns | r | a]
    # slab directly (rows 0:256 -> d2, rows 256:512 -> a2, row 512 -> 1.0 at
    # the r column), so narrow heads never touch masked partial stores.
    small = (jnp.dot(h2.astype(bf16), wout_ref[...], preferred_element_type=f32)
             + bout_ref[...])

    # Single lane-dense output slab: two aligned full-segment stores.
    out_ref[:, 0:H] = l.astype(out_ref.dtype)
    out_ref[:, H:SLAB_W] = small.astype(out_ref.dtype)


# --------------------------------------------------------------------------
# Parameter preparation (runs once, outside the kernel)
# --------------------------------------------------------------------------
def prepare_params(raw, state_dim, action_dim, weight_dtype=jnp.bfloat16):
    """Pack/fuse the raw (in, out)-layout f32 params for the kernel."""
    S, A = state_dim, action_dim
    assert S + 1 + A <= OUT_W, "packed output head must fit in 128 lanes"

    e1_w = raw["e1_w"]                                   # (S+A, H)
    e1_ws = e1_w[:S, :].astype(weight_dtype)
    e1_wa = e1_w[S:, :].astype(weight_dtype)

    # Fused mid weight: cols [0:H]=d1, [H:2H]=a1, [2H:2H+1]=r1, rest 0.
    w_mid = jnp.zeros((H, MID_W), jnp.float32)
    w_mid = w_mid.at[:, 0:H].set(raw["d1_w"])
    w_mid = w_mid.at[:, H:2 * H].set(raw["a1_w"])
    w_mid = w_mid.at[:, 2 * H:2 * H + 1].set(raw["r1_w"])
    b_mid = jnp.zeros((1, MID_W), jnp.float32)
    b_mid = b_mid.at[:, 0:H].set(raw["d1_b"])
    b_mid = b_mid.at[:, H:2 * H].set(raw["a1_b"])

    # Block-diagonal output weight: d -> ns cols [0:S], da -> a cols
    # [S+1:S+1+A], r pass-through (weight 1.0) -> col S.
    w_out = jnp.zeros((MID_W, OUT_W), jnp.float32)
    w_out = w_out.at[0:H, 0:S].set(raw["d2_w"])
    w_out = w_out.at[H:2 * H, S + 1:S + 1 + A].set(raw["a2_w"])
    w_out = w_out.at[2 * H, S].set(1.0)
    b_out = jnp.zeros((1, OUT_W), jnp.float32)
    b_out = b_out.at[:, 0:S].set(raw["d2_b"])
    b_out = b_out.at[:, S + 1:S + 1 + A].set(raw["a2_b"])

    return dict(
        e1_ws=e1_ws,
        e1_wa=e1_wa,
        e1_b=raw["e1_b"].astype(jnp.float32),
        e2_w=raw["e2_w"].astype(weight_dtype),
        e2_b=raw["e2_b"].astype(jnp.float32),
        w_mid=w_mid.astype(weight_dtype),
        b_mid=b_mid,
        w_out=w_out.astype(weight_dtype),
        b_out=b_out,
    )


# --------------------------------------------------------------------------
# Forward wrapper
# --------------------------------------------------------------------------
def encoder_decoder_forward(state, action, pp):
    """Returns (ns, r, a, l) like the PyTorch forward()."""
    B, S = state.shape
    A = action.shape[1]
    assert S + 1 + A <= OUT_W

    # Batch tile: multiple of 8 sublanes, capped at 256 MXU rows per step.
    bm = min(_round_up(B, 8), 256)
    Bp = pl.cdiv(B, bm) * bm
    if Bp != B:
        pad = Bp - B
        state = jnp.pad(state, ((0, pad), (0, 0)))
        action = jnp.pad(action, ((0, pad), (0, 0)))

    grid = (Bp // bm,)

    def w_spec(shape):
        return pl.BlockSpec(shape, lambda i: (0, 0))

    def batch_spec(cols):
        return pl.BlockSpec((bm, cols), lambda i: (i, 0))

    in_specs = [
        batch_spec(S),                 # state
        batch_spec(A),                 # action
        w_spec((S, H)),                # e1_ws
        w_spec((A, H)),                # e1_wa
        w_spec((1, H)),                # e1_b
        w_spec((H, H)),                # e2_w
        w_spec((1, H)),                # e2_b
        w_spec((H, MID_W)),            # w_mid
        w_spec((1, MID_W)),            # b_mid
        w_spec((MID_W, OUT_W)),        # w_out
        w_spec((1, OUT_W)),            # b_out
    ]
    out_specs = pl.BlockSpec((bm, SLAB_W), lambda i: (i, 0))
    out_shape = jax.ShapeDtypeStruct((Bp, SLAB_W), jnp.float32)

    flops = 2 * Bp * (S * H + A * H + H * H + H * MID_W + MID_W * OUT_W)
    weight_bytes = sum(int(v.size) * v.dtype.itemsize for v in pp.values())
    bytes_accessed = (int(state.size) + int(action.size)) * 4 + weight_bytes + Bp * SLAB_W * 4
    cost = pl.CostEstimate(flops=flops, transcendentals=0,
                           bytes_accessed=bytes_accessed)

    fn = pl.pallas_call(
        encoder_decoder_kernel,
        out_shape=out_shape,
        grid=grid,
        in_specs=in_specs,
        out_specs=out_specs,
        compiler_params=pltpu.CompilerParams(
            dimension_semantics=("parallel",)),
        cost_estimate=cost,
    )

    out = fn(state, action,
             pp["e1_ws"], pp["e1_wa"], pp["e1_b"],
             pp["e2_w"], pp["e2_b"],
             pp["w_mid"], pp["b_mid"],
             pp["w_out"], pp["b_out"])

    l = out[:B, 0:H]
    ns = out[:B, H:H + S]
    r = out[:B, H + S:H + S + 1]
    a = out[:B, H + S + 1:H + S + 1 + A]
    return ns, r, a, l


# --------------------------------------------------------------------------
# Init + references
# --------------------------------------------------------------------------
def init_params(key, state_dim, action_dim, hidden=H):
    """Deterministic synthetic init. Weights stored as (in, out), f32."""
    def linear(k, fan_in, fan_out, bias=True):
        kw, kb = jax.random.split(k)
        bound = 1.0 / jnp.sqrt(fan_in)
        w = jax.random.uniform(kw, (fan_in, fan_out), jnp.float32, -bound, bound)
        if bias:
            b = jax.random.uniform(kb, (1, fan_out), jnp.float32, -bound, bound)
            return w, b
        return w, None

    keys = jax.random.split(key, 7)
    Din = state_dim + action_dim
    e1_w, e1_b = linear(keys[0], Din, hidden)
    e2_w, e2_b = linear(keys[1], hidden, hidden)
    r1_w, _    = linear(keys[2], hidden, 1, bias=False)
    a1_w, a1_b = linear(keys[3], hidden, action_dim if False else hidden)  # a1: hidden->hidden
    a2_w, a2_b = linear(keys[4], hidden, action_dim)
    d1_w, d1_b = linear(keys[5], hidden, hidden)
    d2_w, d2_b = linear(keys[6], hidden, state_dim)
    return dict(
        e1_w=e1_w, e1_b=e1_b, e2_w=e2_w, e2_b=e2_b, r1_w=r1_w,
        a1_w=a1_w, a1_b=a1_b, a2_w=a2_w, a2_b=a2_b,
        d1_w=d1_w, d1_b=d1_b, d2_w=d2_w, d2_b=d2_b,
    )


def reference_forward_f32(state, action, p):
    """Plain f32 pure-JAX mirror of the PyTorch forward (exact semantics)."""
    x = jnp.concatenate([state, action], axis=1)
    l = jax.nn.relu(x @ p["e1_w"] + p["e1_b"])
    l = jax.nn.relu(l @ p["e2_w"] + p["e2_b"])
    r = l @ p["r1_w"]
    d = jax.nn.relu(l @ p["d1_w"] + p["d1_b"])
    ns = d @ p["d2_w"] + p["d2_b"]
    da = jax.nn.relu(l @ p["a1_w"] + p["a1_b"])
    a = da @ p["a2_w"] + p["a2_b"]
    return ns, r, a, l


def reference_forward_packed(state, action, pp, state_dim, action_dim):
    """Pure-JAX reference that mirrors the kernel's packed/bf16 arithmetic."""
    S, A = state_dim, action_dim
    bf16, f32 = jnp.bfloat16, jnp.float32

    def mm(x, w):
        return jnp.dot(x.astype(bf16), w, preferred_element_type=f32)

    h1 = mm(state, pp["e1_ws"]) + mm(action, pp["e1_wa"]) + pp["e1_b"]
    h1 = jnp.maximum(h1, 0.0)
    l = jnp.maximum(mm(h1, pp["e2_w"]) + pp["e2_b"], 0.0)
    h2 = mm(l, pp["w_mid"]) + pp["b_mid"]
    col = jnp.arange(MID_W)[None, :]
    h2 = jnp.where(col < 2 * H, jnp.maximum(h2, 0.0), h2)
    small = mm(h2, pp["w_out"]) + pp["b_out"]
    ns = small[:, 0:S]
    r = small[:, S:S + 1]
    a = small[:, S + 1:S + 1 + A]
    return ns, r, a, l


# --------------------------------------------------------------------------
if __name__ == "__main__":
    state_dim, action_dim, batch = 16, 8, 8

    key = jax.random.PRNGKey(0)
    k_state, k_action, k_params = jax.random.split(key, 3)
    state = jax.random.normal(k_state, (batch, state_dim), jnp.float32)
    action = jax.random.normal(k_action, (batch, action_dim), jnp.float32)

    raw = init_params(k_params, state_dim, action_dim)
    pp = prepare_params(raw, state_dim, action_dim)

    ns, r, a, l = encoder_decoder_forward(state, action, pp)
    jax.block_until_ready((ns, r, a, l))

    # Tight check against a pure-JAX mirror of the exact kernel arithmetic.
    ns_m, r_m, a_m, l_m = reference_forward_packed(state, action, pp,
                                                   state_dim, action_dim)
    assert jnp.allclose(ns, ns_m, atol=1e-3, rtol=1e-3), "ns mismatch (packed)"
    assert jnp.allclose(r, r_m, atol=1e-3, rtol=1e-3), "r mismatch (packed)"
    assert jnp.allclose(a, a_m, atol=1e-3, rtol=1e-3), "a mismatch (packed)"
    assert jnp.allclose(l, l_m, atol=1e-3, rtol=1e-3), "l mismatch (packed)"

    # Loose check against the plain f32 PyTorch-semantics reference
    # (difference is just bf16 weight/operand rounding).
    ns_f, r_f, a_f, l_f = reference_forward_f32(state, action, raw)
    assert jnp.allclose(ns, ns_f, atol=5e-2, rtol=2e-2), "ns mismatch (f32)"
    assert jnp.allclose(r, r_f, atol=5e-2, rtol=2e-2), "r mismatch (f32)"
    assert jnp.allclose(a, a_f, atol=5e-2, rtol=2e-2), "a mismatch (f32)"
    assert jnp.allclose(l, l_f, atol=5e-2, rtol=2e-2), "l mismatch (f32)"

    print("KERNEL_OK")
</pallas_src>

<mosaic_0001>
module attributes {stable_mosaic.version = 11 : i64} {
  func.func @encoder_decoder_kernel(%arg0: i32, %arg1: memref<8x16xf32, #tpu.memory_space<vmem>>, %arg2: memref<8x8xf32, #tpu.memory_space<vmem>>, %arg3: memref<16x256xbf16, #tpu.memory_space<vmem>>, %arg4: memref<8x256xbf16, #tpu.memory_space<vmem>>, %arg5: memref<1x256xf32, #tpu.memory_space<vmem>>, %arg6: memref<256x256xbf16, #tpu.memory_space<vmem>>, %arg7: memref<1x256xf32, #tpu.memory_space<vmem>>, %arg8: memref<256x640xbf16, #tpu.memory_space<vmem>>, %arg9: memref<1x640xf32, #tpu.memory_space<vmem>>, %arg10: memref<640x128xbf16, #tpu.memory_space<vmem>>, %arg11: memref<1x128xf32, #tpu.memory_space<vmem>>, %arg12: memref<8x384xf32, #tpu.memory_space<vmem>>) attributes {dimension_semantics = [#tpu.dimension_semantics<parallel>], iteration_bounds = array<i64: 1>, scalar_prefetch = 0 : i64, scratch_operands = 0 : i64, tpu.core_type = #tpu.core_type<tc>, window_params = [{transform_indices = @transform_0, window_bounds = array<i64: 8, 16>}, {transform_indices = @transform_1, window_bounds = array<i64: 8, 8>}, {pipeline_mode = #tpu.pipeline_mode<synchronous>, transform_indices = @transform_2, window_bounds = array<i64: 16, 256>}, {pipeline_mode = #tpu.pipeline_mode<synchronous>, transform_indices = @transform_3, window_bounds = array<i64: 8, 256>}, {pipeline_mode = #tpu.pipeline_mode<synchronous>, transform_indices = @transform_4, window_bounds = array<i64: 1, 256>}, {pipeline_mode = #tpu.pipeline_mode<synchronous>, transform_indices = @transform_5, window_bounds = array<i64: 256, 256>}, {pipeline_mode = #tpu.pipeline_mode<synchronous>, transform_indices = @transform_6, window_bounds = array<i64: 1, 256>}, {pipeline_mode = #tpu.pipeline_mode<synchronous>, transform_indices = @transform_7, window_bounds = array<i64: 256, 640>}, {pipeline_mode = #tpu.pipeline_mode<synchronous>, transform_indices = @transform_8, window_bounds = array<i64: 1, 640>}, {pipeline_mode = #tpu.pipeline_mode<synchronous>, transform_indices = @transform_9, window_bounds = array<i64: 640, 128>}, {pipeline_mode = #tpu.pipeline_mode<synchronous>, transform_indices = @transform_10, window_bounds = array<i64: 1, 128>}, {transform_indices = @transform_11, window_bounds = array<i64: 8, 384>}]} {
    %c0 = arith.constant 0 : index
    %c0_0 = arith.constant 0 : index
    %0 = vector.load %arg1[%c0, %c0_0] : memref<8x16xf32, #tpu.memory_space<vmem>>, vector<8x16xf32>
    %1 = arith.truncf %0 : vector<8x16xf32> to vector<8x16xbf16>
    %c0_1 = arith.constant 0 : index
    %c0_2 = arith.constant 0 : index
    %2 = vector.load %arg2[%c0_1, %c0_2] : memref<8x8xf32, #tpu.memory_space<vmem>>, vector<8x8xf32>
    %3 = arith.truncf %2 : vector<8x8xf32> to vector<8x8xbf16>
    %c0_3 = arith.constant 0 : index
    %c0_4 = arith.constant 0 : index
    %4 = vector.load %arg3[%c0_3, %c0_4] : memref<16x256xbf16, #tpu.memory_space<vmem>>, vector<16x256xbf16>
    %cst = arith.constant dense<0.000000e+00> : vector<8x256xf32>
    %5 = tpu.matmul %1, %4, %cst {dimension_numbers = #tpu.dot_dimension_numbers<[1], [0], [0], [1], [0, 0, 1, 1], [], []>} : vector<8x16xbf16>, vector<16x256xbf16>, vector<8x256xf32> -> vector<8x256xf32>
    %c0_5 = arith.constant 0 : index
    %c0_6 = arith.constant 0 : index
    %6 = vector.load %arg4[%c0_5, %c0_6] : memref<8x256xbf16, #tpu.memory_space<vmem>>, vector<8x256xbf16>
    %cst_7 = arith.constant dense<0.000000e+00> : vector<8x256xf32>
    %7 = tpu.matmul %3, %6, %cst_7 {dimension_numbers = #tpu.dot_dimension_numbers<[1], [0], [0], [1], [0, 0, 1, 1], [], []>} : vector<8x8xbf16>, vector<8x256xbf16>, vector<8x256xf32> -> vector<8x256xf32>
    %8 = arith.addf %5, %7 : vector<8x256xf32>
    %c0_8 = arith.constant 0 : index
    %c0_9 = arith.constant 0 : index
    %9 = vector.load %arg5[%c0_8, %c0_9] : memref<1x256xf32, #tpu.memory_space<vmem>>, vector<1x256xf32>
    %10 = vector.broadcast %9 : vector<1x256xf32> to vector<8x256xf32>
    %11 = arith.addf %8, %10 : vector<8x256xf32>
    %cst_10 = arith.constant 0.000000e+00 : f32
    %12 = vector.broadcast %cst_10 : f32 to vector<8x256xf32>
    %13 = arith.maximumf %11, %12 : vector<8x256xf32>
    %14 = arith.truncf %13 : vector<8x256xf32> to vector<8x256xbf16>
    %c0_11 = arith.constant 0 : index
    %c0_12 = arith.constant 0 : index
    %15 = vector.load %arg6[%c0_11, %c0_12] : memref<256x256xbf16, #tpu.memory_space<vmem>>, vector<256x256xbf16>
    %cst_13 = arith.constant dense<0.000000e+00> : vector<8x256xf32>
    %16 = tpu.matmul %14, %15, %cst_13 {dimension_numbers = #tpu.dot_dimension_numbers<[1], [0], [0], [1], [0, 0, 1, 1], [], []>} : vector<8x256xbf16>, vector<256x256xbf16>, vector<8x256xf32> -> vector<8x256xf32>
    %c0_14 = arith.constant 0 : index
    %c0_15 = arith.constant 0 : index
    %17 = vector.load %arg7[%c0_14, %c0_15] : memref<1x256xf32, #tpu.memory_space<vmem>>, vector<1x256xf32>
    %18 = vector.broadcast %17 : vector<1x256xf32> to vector<8x256xf32>
    %19 = arith.addf %16, %18 : vector<8x256xf32>
    %cst_16 = arith.constant 0.000000e+00 : f32
    %20 = vector.broadcast %cst_16 : f32 to vector<8x256xf32>
    %21 = arith.maximumf %19, %20 : vector<8x256xf32>
    %22 = arith.truncf %21 : vector<8x256xf32> to vector<8x256xbf16>
    %c0_17 = arith.constant 0 : index
    %c0_18 = arith.constant 0 : index
    %23 = vector.load %arg8[%c0_17, %c0_18] : memref<256x640xbf16, #tpu.memory_space<vmem>>, vector<256x640xbf16>
    %cst_19 = arith.constant dense<0.000000e+00> : vector<8x640xf32>
    %24 = tpu.matmul %22, %23, %cst_19 {dimension_numbers = #tpu.dot_dimension_numbers<[1], [0], [0], [1], [0, 0, 1, 1], [], []>} : vector<8x256xbf16>, vector<256x640xbf16>, vector<8x640xf32> -> vector<8x640xf32>
    %c0_20 = arith.constant 0 : index
    %c0_21 = arith.constant 0 : index
    %25 = vector.load %arg9[%c0_20, %c0_21] : memref<1x640xf32, #tpu.memory_space<vmem>>, vector<1x640xf32>
    %26 = vector.broadcast %25 : vector<1x640xf32> to vector<8x640xf32>
    %27 = arith.addf %24, %26 : vector<8x640xf32>
    %28 = tpu.iota {dimensions = array<i32: 1>} : vector<8x640xi32>
    %c512_i32 = arith.constant 512 : i32
    %29 = vector.broadcast %c512_i32 : i32 to vector<8x640xi32>
    %30 = arith.cmpi slt, %28, %29 : vector<8x640xi32>
    %cst_22 = arith.constant 0.000000e+00 : f32
    %31 = vector.broadcast %cst_22 : f32 to vector<8x640xf32>
    %32 = arith.maximumf %27, %31 : vector<8x640xf32>
    %33 = arith.select %30, %32, %27 : vector<8x640xi1>, vector<8x640xf32>
    %34 = arith.truncf %33 : vector<8x640xf32> to vector<8x640xbf16>
    %c0_23 = arith.constant 0 : index
    %c0_24 = arith.constant 0 : index
    %35 = vector.load %arg10[%c0_23, %c0_24] : memref<640x128xbf16, #tpu.memory_space<vmem>>, vector<640x128xbf16>
    %cst_25 = arith.constant dense<0.000000e+00> : vector<8x128xf32>
    %36 = tpu.matmul %34, %35, %cst_25 {dimension_numbers = #tpu.dot_dimension_numbers<[1], [0], [0], [1], [0, 0, 1, 1], [], []>} : vector<8x640xbf16>, vector<640x128xbf16>, vector<8x128xf32> -> vector<8x128xf32>
    %c0_26 = arith.constant 0 : index
    %c0_27 = arith.constant 0 : index
    %37 = vector.load %arg11[%c0_26, %c0_27] : memref<1x128xf32, #tpu.memory_space<vmem>>, vector<1x128xf32>
    %38 = vector.broadcast %37 : vector<1x128xf32> to vector<8x128xf32>
    %39 = arith.addf %36, %38 : vector<8x128xf32>
    %c0_28 = arith.constant 0 : index
    %c0_29 = arith.constant 0 : index
    %40 = vector.load %arg12[%c0_28, %c0_29] : memref<8x384xf32, #tpu.memory_space<vmem>>, vector<8x256xf32>
    tpu.vector_store %arg12[%c0_28, %c0_29], %21 {strides = array<i32>} : memref<8x384xf32, #tpu.memory_space<vmem>>, vector<8x256xf32>,
    %c0_30 = arith.constant 0 : index
    %c256 = arith.constant 256 : index
    %41 = vector.load %arg12[%c0_30, %c256] : memref<8x384xf32, #tpu.memory_space<vmem>>, vector<8x128xf32>
    tpu.vector_store %arg12[%c0_30, %c256], %39 {strides = array<i32>} : memref<8x384xf32, #tpu.memory_space<vmem>>, vector<8x128xf32>,
    return
  }
  func.func @transform_0(%arg0: i32) -> (i32, i32) {
    %c0_i32 = arith.constant 0 : i32
    %c0_i32_0 = arith.constant 0 : i32
    return %arg0, %c0_i32 : i32, i32
  }
  func.func @transform_1(%arg0: i32) -> (i32, i32) {
    %c0_i32 = arith.constant 0 : i32
    %c0_i32_0 = arith.constant 0 : i32
    return %arg0, %c0_i32 : i32, i32
  }
  func.func @transform_2(%arg0: i32) -> (i32, i32) {
    %c0_i32 = arith.constant 0 : i32
    %c0_i32_0 = arith.constant 0 : i32
    %c0_i32_1 = arith.constant 0 : i32
    return %c0_i32, %c0_i32_0 : i32, i32
  }
  func.func @transform_3(%arg0: i32) -> (i32, i32) {
    %c0_i32 = arith.constant 0 : i32
    %c0_i32_0 = arith.constant 0 : i32
    %c0_i32_1 = arith.constant 0 : i32
    return %c0_i32, %c0_i32_0 : i32, i32
  }
  func.func @transform_4(%arg0: i32) -> (i32, i32) {
    %c0_i32 = arith.constant 0 : i32
    %c0_i32_0 = arith.constant 0 : i32
    %c0_i32_1 = arith.constant 0 : i32
    return %c0_i32, %c0_i32_0 : i32, i32
  }
  func.func @transform_5(%arg0: i32) -> (i32, i32) {
    %c0_i32 = arith.constant 0 : i32
    %c0_i32_0 = arith.constant 0 : i32
    %c0_i32_1 = arith.constant 0 : i32
    return %c0_i32, %c0_i32_0 : i32, i32
  }
  func.func @transform_6(%arg0: i32) -> (i32, i32) {
    %c0_i32 = arith.constant 0 : i32
    %c0_i32_0 = arith.constant 0 : i32
    %c0_i32_1 = arith.constant 0 : i32
    return %c0_i32, %c0_i32_0 : i32, i32
  }
  func.func @transform_7(%arg0: i32) -> (i32, i32) {
    %c0_i32 = arith.constant 0 : i32
    %c0_i32_0 = arith.constant 0 : i32
    %c0_i32_1 = arith.constant 0 : i32
    return %c0_i32, %c0_i32_0 : i32, i32
  }
  func.func @transform_8(%arg0: i32) -> (i32, i32) {
    %c0_i32 = arith.constant 0 : i32
    %c0_i32_0 = arith.constant 0 : i32
    %c0_i32_1 = arith.constant 0 : i32
    return %c0_i32, %c0_i32_0 : i32, i32
  }
  func.func @transform_9(%arg0: i32) -> (i32, i32) {
    %c0_i32 = arith.constant 0 : i32
    %c0_i32_0 = arith.constant 0 : i32
    %c0_i32_1 = arith.constant 0 : i32
    return %c0_i32, %c0_i32_0 : i32, i32
  }
  func.func @transform_10(%arg0: i32) -> (i32, i32) {
    %c0_i32 = arith.constant 0 : i32
    %c0_i32_0 = arith.constant 0 : i32
    %c0_i32_1 = arith.constant 0 : i32
    return %c0_i32, %c0_i32_0 : i32, i32
  }
  func.func @transform_11(%arg0: i32) -> (i32, i32) {
    %c0_i32 = arith.constant 0 : i32
    %c0_i32_0 = arith.constant 0 : i32
    return %arg0, %c0_i32 : i32, i32
  }
}

</mosaic_0001>

<bundles_post_ra>
// kernel: tpu_custom_call.1
= control target key start
LH: loop header
LB: loop body
LE: loop exit
PB: predicated region body
PF: predicated region fallthrough
CT: control target
= control target key end

     0   :  { %16 = vsyncpa [#allocation3], 0  ;;  %s2497_s0 = inlined_call_operand.hbm [shape: f32[8,16], index: 0, kind: input, shape index: {}]   ;;  %s2498_s1 = inlined_call_operand.hbm [shape: f32[8,8], index: 1, kind: input, shape index: {}]   ;;  %s2499_s2 = inlined_call_operand.hbm [shape: bf16[16,256], index: 2, kind: input, shape index: {}]   ;;  %s2500_s3 = inlined_call_operand.vmem [shape: bf16[8,256], index: 3, kind: input, shape index: {}]   ;;  %s2501_s4 = inlined_call_operand.vmem [shape: f32[1,256], index: 4, kind: input, shape index: {}]   ;;  %s2502_s5 = inlined_call_operand.hbm [shape: bf16[256,256], index: 5, kind: input, shape index: {}]   ;;  %s2503_s6 = inlined_call_operand.vmem [shape: f32[1,256], index: 6, kind: input, shape index: {}]   ;;  %s2504_s7 = inlined_call_operand.hbm [shape: bf16[256,640], index: 7, kind: input, shape index: {}]   ;;  %s2505_s8 = inlined_call_operand.vmem [shape: f32[1,640], index: 8, kind: input, shape index: {}]   ;;  %s2506_s9 = inlined_call_operand.hbm [shape: bf16[640,128], index: 9, kind: input, shape index: {}]   ;;  %s2507_s10 = inlined_call_operand.vmem [shape: f32[1,128], index: 10, kind: input, shape index: {}]   ;;  %s2508_s11 = inlined_call_operand.hbm [shape: f32[8,384], index: 11, kind: output, shape index: {}]  }
   0x1   :  { %17 = vsyncpa [#allocation6], 0 }
   0x2   :  { %18 = vsyncpa [#allocation9], 0 }
   0x3   :  { %19 = vsyncpa [#allocation12], 0 }
   0x4   :  { %20 = vsyncpa [#allocation4], 0  ;;  %s2299_s17 = smov [#allocation5]   ;;  %s2135_s21 = scalar_lea.hbm %s2498_s1, 128 }
   0x5   :  { %s37_s18 = sshll.u32 %s2299_s17, 4  ;;  %p2136_p0 = scmp.ne.s32.totalorder %s2498_s1, %s2135_s21  ;;  %s38_s18 = int_to_ptr.vmem [resolvable:$true] %s37_s18 }
   0x6   :  { %p2139_p1 = scmp.lt.u32.totalorder %s2135_s21, %s2498_s1 }
   0x8   :  { %p2141_p2 = pnand %p2139_p1, %p2136_p0 }
   0xa   :  { %2144 = shalt.err (!%p2141_p2)
}
   0xb   :  { %s2145_s26 = scalar_lea.vmem %s38_s18, 128  ;;  %p2150_p4 = scmp.lt.s32.totalorder %s38_s18, %s38_s18 }
   0xc   :  { %p2146_p3 = scmp.ne.s32.totalorder %s38_s18, %s2145_s26  ;;  %p2151_p5 = scmp.lt.s32.totalorder %s2145_s26, %s2145_s26 }
   0xe   :  { %p2152_p6 = por %p2151_p5, %p2150_p4 }
  0x10   :  { %p2153_p7 = pnand %p2152_p6, %p2146_p3 }
  0x12   :  { %2156 = shalt.err (!%p2153_p7)
}
  0x13   :  { %40 = dma.hbm_to_vmem [thread:$0]  %s2498_s1, 128, %s38_s18, [#allocation6]  }
  0x14   :  { %s2300_s29 = smov [#allocation8]   ;;  %s2301_s12 = smov [#allocation2]  }
  0x15   :  { %s62_s30 = sshll.u32 %s2300_s29, 4  ;;  %s27_s13 = sshll.u32 %s2301_s12, 4  ;;  %s63_s30 = int_to_ptr.vmem [resolvable:$true] %s62_s30  ;;  %s28_s13 = int_to_ptr.vmem [resolvable:$true] %s27_s13 }
  0x16   :  { %s2157_s16 = scalar_lea.hbm %s2502_s5, 4096 }
  0x17   :  { %p2158_p8 = scmp.ne.s32.totalorder %s2502_s5, %s2157_s16  ;;  %p2161_p9 = scmp.lt.u32.totalorder %s2157_s16, %s2502_s5 }
  0x19   :  { %p2163_p10 = pnand %p2161_p9, %p2158_p8 }
  0x1b   :  { %2166 = shalt.err (!%p2163_p10)
}
  0x1c   :  { %s2167_s1 = scalar_lea.vmem %s63_s30, 4096  ;;  %p2172_p12 = scmp.lt.s32.totalorder %s63_s30, %s63_s30 }
  0x1d   :  { %p2168_p11 = scmp.ne.s32.totalorder %s63_s30, %s2167_s1  ;;  %p2173_p13 = scmp.lt.s32.totalorder %s2167_s1, %s2167_s1 }
  0x1f   :  { %p2174_p0 = por %p2173_p13, %p2172_p12 }
  0x21   :  { %p2175_p1 = pnand %p2174_p0, %p2168_p11 }
  0x23   :  { %2178 = shalt.err (!%p2175_p1)
}
  0x24   :  { %s2302_s18 = smov 128   ;;  %s2303_s22 = smov 8  }
  0x25   :  { %68 = dma.hbm_to_vmem [thread:$0]  %s2502_s5, 4096, %s63_s30, [#allocation9], %s2302_s18, %s2302_s18, %s2303_s22  }
  0x26   :  { %s2179_s27 = scalar_lea.hbm %s2497_s0, 128 }
  0x27   :  { %p2180_p2 = scmp.ne.s32.totalorder %s2497_s0, %s2179_s27  ;;  %p2183_p3 = scmp.lt.u32.totalorder %s2179_s27, %s2497_s0 }
  0x29   :  { %p2185_p4 = pnand %p2183_p3, %p2180_p2 }
  0x2b   :  { %2188 = shalt.err (!%p2185_p4)
}
  0x2c   :  { %s2189_s15 = scalar_lea.vmem %s28_s13, 128  ;;  %p2194_p6 = scmp.lt.s32.totalorder %s28_s13, %s28_s13 }
  0x2d   :  { %p2190_p5 = scmp.ne.s32.totalorder %s28_s13, %s2189_s15  ;;  %p2195_p7 = scmp.lt.s32.totalorder %s2189_s15, %s2189_s15 }
  0x2f   :  { %p2196_p8 = por %p2195_p7, %p2194_p6 }
  0x31   :  { %p2197_p9 = pnand %p2196_p8, %p2190_p5 }
  0x33   :  { %2200 = shalt.err (!%p2197_p9)
}
  0x34   :  { %30 = dma.hbm_to_vmem [thread:$0]  %s2497_s0, 128, %s28_s13, [#allocation3]  }
  0x35   :  { %s2304_s16 = smov [#allocation7]   ;;  %s2305_s19 = smov [#allocation10]  }
  0x36   :  { %s46_s17 = sshll.u32 %s2304_s16, 4  ;;  %s76_s20 = sshll.u32 %s2305_s19, 4  ;;  %s47_s17 = int_to_ptr.vmem [resolvable:$true] %s46_s17  ;;  %s77_s20 = int_to_ptr.vmem [resolvable:$true] %s76_s20 }
  0x37   :  { %s2201_s23 = scalar_lea.hbm %s2499_s2, 256 }
  0x38   :  { %p2202_p10 = scmp.ne.s32.totalorder %s2499_s2, %s2201_s23  ;;  %p2205_p11 = scmp.lt.u32.totalorder %s2201_s23, %s2499_s2 }
  0x3a   :  { %p2207_p12 = pnand %p2205_p11, %p2202_p10 }
  0x3c   :  { %2210 = shalt.err (!%p2207_p12)
}
  0x3d   :  { %s2211_s0 = scalar_lea.vmem %s47_s17, 256  ;;  %p2216_p0 = scmp.lt.s32.totalorder %s47_s17, %s47_s17 }
  0x3e   :  { %p2212_p13 = scmp.ne.s32.totalorder %s47_s17, %s2211_s0  ;;  %p2217_p1 = scmp.lt.s32.totalorder %s2211_s0, %s2211_s0 }
  0x40   :  { %p2218_p2 = por %p2217_p1, %p2216_p0 }
  0x42   :  { %p2219_p3 = pnand %p2218_p2, %p2212_p13 }
  0x44   :  { %2222 = shalt.err (!%p2219_p3)
}
  0x45   :  { %52 = dma.hbm_to_vmem [thread:$0]  %s2499_s2, 256, %s47_s17, [#allocation6], %s2302_s18, %s2302_s18, %s2303_s22  }
  0x46   :  { %s2223_s14 = scalar_lea.hbm %s2504_s7, 10240 }
  0x47   :  { %p2224_p4 = scmp.ne.s32.totalorder %s2504_s7, %s2223_s14  ;;  %p2227_p5 = scmp.lt.u32.totalorder %s2223_s14, %s2504_s7 }
  0x49   :  { %p2229_p6 = pnand %p2227_p5, %p2224_p4 }
  0x4b   :  { %2232 = shalt.err (!%p2229_p6)
}
  0x4c   :  { %s2233_s19 = scalar_lea.vmem %s77_s20, 10240  ;;  %p2238_p8 = scmp.lt.s32.totalorder %s77_s20, %s77_s20 }
  0x4d   :  { %p2234_p7 = scmp.ne.s32.totalorder %s77_s20, %s2233_s19  ;;  %p2239_p9 = scmp.lt.s32.totalorder %s2233_s19, %s2233_s19 }
  0x4f   :  { %p2240_p10 = por %p2239_p9, %p2238_p8 }
  0x51   :  { %p2241_p11 = pnand %p2240_p10, %p2234_p7 }
  0x53   :  { %2244 = shalt.err (!%p2241_p11)
}
  0x54   :  { %s2306_s2 = smov 320   ;;  %s2307_s18 = smov 20  }
  0x55   :  { %82 = dma.hbm_to_vmem [thread:$0]  %s2504_s7, 10240, %s77_s20, [#allocation9], %s2306_s2, %s2306_s2, %s2307_s18  }
  0x56   :  { %s2308_s21 = smov [#allocation11]   ;;  %s2245_s25 = scalar_lea.hbm %s2506_s9, 5120 }
  0x57   :  { %s90_s1 = sshll.u32 %s2308_s21, 4  ;;  %p2246_p12 = scmp.ne.s32.totalorder %s2506_s9, %s2245_s25  ;;  %s91_s1 = int_to_ptr.vmem [resolvable:$true] %s90_s1 }
  0x58   :  { %p2249_p13 = scmp.lt.u32.totalorder %s2245_s25, %s2506_s9 }
  0x5a   :  { %p2251_p0 = pnand %p2249_p13, %p2246_p12 }
  0x5c   :  { %2254 = shalt.err (!%p2251_p0)
}
  0x5d   :  { %s2255_s28 = scalar_lea.vmem %s91_s1, 5120  ;;  %p2260_p2 = scmp.lt.s32.totalorder %s91_s1, %s91_s1 }
  0x5e   :  { %p2256_p1 = scmp.ne.s32.totalorder %s91_s1, %s2255_s28  ;;  %p2261_p3 = scmp.lt.s32.totalorder %s2255_s28, %s2255_s28 }
  0x60   :  { %p2262_p4 = por %p2261_p3, %p2260_p2 }
  0x62   :  { %p2263_p5 = pnand %p2262_p4, %p2256_p1 }
  0x64   :  { %2266 = shalt.err (!%p2263_p5)
}
  0x65   :  { %s2309_s7 = smov 64   ;;  %s2310_s20 = smov 4  }
  0x66   :  { %96 = dma.hbm_to_vmem [thread:$0]  %s2506_s9, 5120, %s91_s1, [#allocation12], %s2309_s7, %s2309_s7, %s2310_s20  }
  0x67   :  { %2289 = dma.done.wait [#allocation3], 128  }
  0x68   :  { %2290 = vsyncadd [#allocation3], 4294967168 }
  0x69   :  { %2291 = dma.done.wait [#allocation6], 384  }
  0x6a   :  { %2292 = vsyncadd [#allocation6], 4294966912 }
  0x6b   :  { %2293 = dma.done.wait [#allocation9], 14336  }
  0x6c   :  { %2294 = vsyncadd [#allocation9], 4294952960 }
  0x6d   :  { %2295 = dma.done.wait [#allocation12], 5120  }
  0x6e   :  { %2296 = vsyncadd [#allocation12], 4294962176  ;;  %v2311_v0 = vmov 0   ;;  %v124_v1 = vld [vmem:[%s2500_s3] sm:$0xff]  ;;  %vm134_vm0 = vcmask 1043456   ;;  %v120_v6 = vld [vmem:[#allocation5] sm:$0xff] }
  0x6f   :  { %173 = vmatprep.mubr.bf16.mxu0 %v2311_v0  ;;  %228 = vmatprep.mubr.bf16.mxu1 %v2311_v0  ;;  %v1660_v2 = vcombine.high %v124_v1, %v124_v1  ;;  %v1931_v3 = vld [vmem:[#allocation7 + $0x4] ss:$8 sps:$4 sm:$0xff]   ;;  %v1659_v4 = vcombine.low %v124_v1, %v124_v1  ;;  %v1934_v5 = vld [vmem:[#allocation7] ss:$8 sps:$4 sm:$0xff]   ;;  %v118_v7 = vld [vmem:[#allocation2] sm:$0xff]  ;;  %v121_v9 = vpack.c.bf16 %v120_v6, %v120_v6  ;;  %vm130_vm1 = vcmask 64512  }
  0x70   :  { %196 = vmatprep.subr.bf16.mxu1 %v1931_v3  ;;  %v119_v10 = vpack.c.bf16 %v118_v7, %v118_v7  ;;  %v1937_v11 = vld [vmem:[#allocation8 + $0x4] ss:$8 sps:$4 sm:$0xff]   ;;  %vm192_vm2 = vcmask 130048   ;;  %v1935_v12 = vld [vmem:[#allocation8] ss:$8 sps:$4 sm:$0xff]   ;;  %vm2313_vm3 = vmmov 0  }
  0x71   :  { %1661 = vmatprep.subr.msk.bf16.mxu0 %vm134_vm0, %v1660_v2  ;;  %v136_v8 = vsel %vm134_vm0, %v1659_v4, 0  ;;  %197 = vmatpush1.bf16.msra.mxu1 %v1934_v5  ;;  %v1940_v13 = vld [vmem:[#allocation8 + $0x14] ss:$8 sps:$4 sm:$0xff]   ;;  %v1938_v14 = vld [vmem:[#allocation8 + $0x10] ss:$8 sps:$4 sm:$0xff]   ;;  %s2314_s19 = smov [#allocation13]  }
  0x72   :  { %142 = vmatpush1.bf16.msra.mxu0 %v136_v8  ;;  %v1943_v15 = vld [vmem:[#allocation8 + $0x24] ss:$8 sps:$4 sm:$0xff]   ;;  %v1941_v16 = vld [vmem:[#allocation8 + $0x20] ss:$8 sps:$4 sm:$0xff]   ;;  %v1946_v17 = vld [vmem:[#allocation8 + $0x34] ss:$8 sps:$4 sm:$0xff]   ;;  %v239_v8 = vlaneseq }
  0x73   :  { %459 = vmatprep.subr.bf16.mxu0 %v1937_v11  ;;  %v1944_v18 = vld [vmem:[#allocation8 + $0x30] ss:$8 sps:$4 sm:$0xff]   ;;  %v1949_v19 = vld [vmem:[#allocation8 + $0x44] ss:$8 sps:$4 sm:$0xff]   ;;  %v1947_v20 = vld [vmem:[#allocation8 + $0x40] ss:$8 sps:$4 sm:$0xff]  }
  0x74   :  { %1665 = vmatmul.mubr.msk.bf16.vlgmr.msra.gmra.mrb[0].mxu1 %vm192_vm2, %v119_v10  ;;  %v1952_v21 = vld [vmem:[#allocation8 + $0x54] ss:$8 sps:$4 sm:$0xff]   ;;  %v1950_v22 = vld [vmem:[#allocation8 + $0x50] ss:$8 sps:$4 sm:$0xff]   ;;  %v1955_v23 = vld [vmem:[#allocation8 + $0x64] ss:$8 sps:$4 sm:$0xff]  }
  0x75   :  { %1662 = vmatmul.mubr.msk.bf16.vlgmr.msra.gmra.mrb[0].mxu0 %vm130_vm1, %v121_v9  ;;  %v1953_v24 = vld [vmem:[#allocation8 + $0x60] ss:$8 sps:$4 sm:$0xff]   ;;  %v1958_v25 = vld [vmem:[#allocation8 + $0x74] ss:$8 sps:$4 sm:$0xff]   ;;  %v1956_v26 = vld [vmem:[#allocation8 + $0x70] ss:$8 sps:$4 sm:$0xff]  }
  0x76   :  { %460 = vmatpush1.bf16.msra.mxu0 %v1935_v12  ;;  %v1961_v27 = vld [vmem:[#allocation8 + $0x84] ss:$8 sps:$4 sm:$0xff]   ;;  %v1959_v28 = vld [vmem:[#allocation8 + $0x80] ss:$8 sps:$4 sm:$0xff]   ;;  %v1964_v29 = vld [vmem:[#allocation8 + $0x94] ss:$8 sps:$4 sm:$0xff]  }
  0x77   :  { %461 = vmatprep.subr.bf16.mxu0 %v1940_v13  ;;  %v1962_v30 = vld [vmem:[#allocation8 + $0x90] ss:$8 sps:$4 sm:$0xff]   ;;  %v1967_v31 = vld [vmem:[#allocation8 + $0xa4] ss:$8 sps:$4 sm:$0xff]   ;;  %v1965_v32 = vld [vmem:[#allocation8 + $0xa0] ss:$8 sps:$4 sm:$0xff]  }
  0x78   :  { %v1970_v33 = vld [vmem:[#allocation8 + $0xb4] ss:$8 sps:$4 sm:$0xff]   ;;  %v1968_v34 = vld [vmem:[#allocation8 + $0xb0] ss:$8 sps:$4 sm:$0xff]   ;;  %v1973_v35 = vld [vmem:[#allocation8 + $0xc4] ss:$8 sps:$4 sm:$0xff]  }
  0x79   :  { %v1971_v36 = vld [vmem:[#allocation8 + $0xc0] ss:$8 sps:$4 sm:$0xff]   ;;  %v1976_v37 = vld [vmem:[#allocation8 + $0xd4] ss:$8 sps:$4 sm:$0xff]   ;;  %v1974_v38 = vld [vmem:[#allocation8 + $0xd0] ss:$8 sps:$4 sm:$0xff]  }
  0x7a   :  { %462 = vmatpush1.bf16.msra.mxu0 %v1938_v14  ;;  %v1979_v39 = vld [vmem:[#allocation8 + $0xe4] ss:$8 sps:$4 sm:$0xff]   ;;  %v1977_v40 = vld [vmem:[#allocation8 + $0xe0] ss:$8 sps:$4 sm:$0xff]   ;;  %v1982_v41 = vld [vmem:[#allocation8 + $0xf4] ss:$8 sps:$4 sm:$0xff]  }
  0x7b   :  { %463 = vmatprep.subr.bf16.mxu0 %v1943_v15  ;;  %v1980_v42 = vld [vmem:[#allocation8 + $0xf0] ss:$8 sps:$4 sm:$0xff]   ;;  %v1983_v43 = vld [vmem:[#allocation10] ss:$20 sps:$4 sm:$0xff]   ;;  %v1989_v47 = vld [vmem:[#allocation10 + $0x28] ss:$20 sps:$4 sm:$0xff]  }
  0x7c   :  { %v1985_v44 = vld [vmem:[#allocation10 + $0x4] ss:$20 sps:$4 sm:$0xff]   ;;  %v1988_v45 = vld [vmem:[#allocation10 + $0xc] ss:$20 sps:$4 sm:$0xff]   ;;  %v1997_v48 = vld [vmem:[#allocation10 + $0x54] ss:$20 sps:$4 sm:$0xff]  }
  0x7d   :  { %v1991_v46 = vld [vmem:[#allocation10 + $0x2c] ss:$20 sps:$4 sm:$0xff]   ;;  %1043 = vmatprep.subr.bf16.mxu1 %v1985_v44  ;;  %v1995_v49 = vld [vmem:[#allocation10 + $0x50] ss:$20 sps:$4 sm:$0xff]   ;;  %v2013_v55 = vld [vmem:[#allocation10 + $0xc8] ss:$20 sps:$4 sm:$0xff]  }
  0x7e   :  { %464 = vmatpush1.bf16.msra.mxu0 %v1941_v16  ;;  %1044 = vmatpush1.bf16.msra.mxu1 %v1983_v43  ;;  %v2003_v50 = vld [vmem:[#allocation10 + $0x7c] ss:$20 sps:$4 sm:$0xff]   ;;  %v2001_v51 = vld [vmem:[#allocation10 + $0x78] ss:$20 sps:$4 sm:$0xff]   ;;  %v2007_v53 = vld [vmem:[#allocation10 + $0xa0] ss:$20 sps:$4 sm:$0xff]  }
  0x7f   :  { %465 = vmatprep.subr.bf16.mxu0 %v1946_v17  ;;  %1045 = vmatprep.subr.bf16.mxu1 %v1991_v46  ;;  %v2009_v52 = vld [vmem:[#allocation10 + $0xa4] ss:$20 sps:$4 sm:$0xff]   ;;  %v2015_v54 = vld [vmem:[#allocation10 + $0xcc] ss:$20 sps:$4 sm:$0xff]   ;;  %v2021_v56 = vld [vmem:[#allocation10 + $0xf4] ss:$20 sps:$4 sm:$0xff]  }
  0x80   :  { %v2019_v57 = vld [vmem:[#allocation10 + $0xf0] ss:$20 sps:$4 sm:$0xff]   ;;  %v2025_v59 = vld [vmem:[#allocation10 + $0x118] ss:$20 sps:$4 sm:$0xff]   ;;  %v2031_v61 = vld [vmem:[#allocation10 + $0x140] ss:$20 sps:$4 sm:$0xff]  }
  0x81   :  { %v2027_v58 = vld [vmem:[#allocation10 + $0x11c] ss:$20 sps:$4 sm:$0xff]   ;;  %v2033_v60 = vld [vmem:[#allocation10 + $0x144] ss:$20 sps:$4 sm:$0xff]   ;;  %v2039_v62 = vld [vmem:[#allocation10 + $0x16c] ss:$20 sps:$4 sm:$0xff]  }
  0x82   :  { %466 = vmatpush1.bf16.msra.mxu0 %v1944_v18  ;;  %1046 = vmatpush1.bf16.msra.mxu1 %v1989_v47  ;;  %v2037_v63 = vld [vmem:[#allocation10 + $0x168] ss:$20 sps:$4 sm:$0xff]   ;;  %v2043_v1 = vld [vmem:[#allocation10 + $0x190] ss:$20 sps:$4 sm:$0xff]   ;;  %v2049_v3 = vld [vmem:[#allocation10 + $0x1b8] ss:$20 sps:$4 sm:$0xff]  }
  0x83   :  { %467 = vmatprep.subr.bf16.mxu0 %v1949_v19  ;;  %1047 = vmatprep.subr.bf16.mxu1 %v1997_v48  ;;  %v2045_v0 = vld [vmem:[#allocation10 + $0x194] ss:$20 sps:$4 sm:$0xff]   ;;  %v2051_v2 = vld [vmem:[#allocation10 + $0x1bc] ss:$20 sps:$4 sm:$0xff]   ;;  %v2057_v4 = vld [vmem:[#allocation10 + $0x1e4] ss:$20 sps:$4 sm:$0xff]  }
  0x84   :  { %v2055_v5 = vld [vmem:[#allocation10 + $0x1e0] ss:$20 sps:$4 sm:$0xff]   ;;  %v2061_v7 = vld [vmem:[#allocation10 + $0x208] ss:$20 sps:$4 sm:$0xff]   ;;  %v2456_v9 = vshrl.u32 %v239_v8, 7  ;;  %s1647_s2 = sshll.u32 %s2314_s19, 4  ;;  %s1648_s2 = int_to_ptr.vmem [resolvable:$true] %s1647_s2 }
  0x85   :  { %v2063_v6 = vld [vmem:[#allocation10 + $0x20c] ss:$20 sps:$4 sm:$0xff]   ;;  %v2030_v44 = vld [vmem:[#allocation10 + $0x124] ss:$20 sps:$4 sm:$0xff]   ;;  %v2034_v47 = vld [vmem:[#allocation10 + $0x148] ss:$20 sps:$4 sm:$0xff]   ;;  %p2272_p7 = scmp.lt.s32.totalorder %s1648_s2, %s1648_s2 }
  0x86   :  { %468 = vmatpush1.bf16.msra.mxu0 %v1947_v20  ;;  %1048 = vmatpush1.bf16.msra.mxu1 %v1995_v49  ;;  %v2459_v10 = vsub.s32 0, %v2456_v9  ;;  %v237_v11 = vld [vmem:[%s2501_s4] sm:$0x3]  ;;  %v2465_v12 = vsub.s32 1, %v2456_v9  ;;  %v2022_v43 = vld [vmem:[#allocation10 + $0xf8] ss:$20 sps:$4 sm:$0xff]  }
  0x87   :  { %469 = vmatprep.subr.bf16.mxu0 %v1952_v21  ;;  %1049 = vmatprep.subr.bf16.mxu1 %v2003_v50  ;;  %v2036_v46 = vld [vmem:[#allocation10 + $0x14c] ss:$20 sps:$4 sm:$0xff]   ;;  %v2042_v48 = vld [vmem:[#allocation10 + $0x174] ss:$20 sps:$4 sm:$0xff]   ;;  %v2040_v49 = vld [vmem:[#allocation10 + $0x170] ss:$20 sps:$4 sm:$0xff]  }
  0x88   :  { %v242_v13 = vrot.slane %v237_v11, %v2459_v10  ;;  %v246_v16 = vrot.slane %v237_v11, %v2465_v12  ;;  %v2048_v50 = vld [vmem:[#allocation10 + $0x19c] ss:$20 sps:$4 sm:$0xff]  }
  0x8a   :  { %470 = vmatpush1.bf16.msra.mxu0 %v1950_v22  ;;  %1050 = vmatpush1.bf16.msra.mxu1 %v2001_v51  ;;  %v2046_v51 = vld [vmem:[#allocation10 + $0x198] ss:$20 sps:$4 sm:$0xff]  }
  0x8b   :  { %471 = vmatprep.subr.bf16.mxu0 %v1955_v23  ;;  %1051 = vmatprep.subr.bf16.mxu1 %v2009_v52  ;;  %v2054_v52 = vld [vmem:[#allocation10 + $0x1c4] ss:$20 sps:$4 sm:$0xff]  }
  0x8e   :  { %472 = vmatpush1.bf16.msra.mxu0 %v1953_v24  ;;  %1052 = vmatpush1.bf16.msra.mxu1 %v2007_v53  ;;  %v2052_v53 = vld [vmem:[#allocation10 + $0x1c0] ss:$20 sps:$4 sm:$0xff]  }
  0x8f   :  { %473 = vmatprep.subr.bf16.mxu0 %v1958_v25  ;;  %1053 = vmatprep.subr.bf16.mxu1 %v2015_v54  ;;  %v2060_v54 = vld [vmem:[#allocation10 + $0x1ec] ss:$20 sps:$4 sm:$0xff]  }
  0x92   :  { %474 = vmatpush1.bf16.msra.mxu0 %v1956_v26  ;;  %1054 = vmatpush1.bf16.msra.mxu1 %v2013_v55  ;;  %v2058_v55 = vld [vmem:[#allocation10 + $0x1e8] ss:$20 sps:$4 sm:$0xff]  }
  0x93   :  { %475 = vmatprep.subr.bf16.mxu0 %v1961_v27  ;;  %1055 = vmatprep.subr.bf16.mxu1 %v2021_v56  ;;  %v2066_v56 = vld [vmem:[#allocation10 + $0x214] ss:$20 sps:$4 sm:$0xff]  }
  0x96   :  { %476 = vmatpush1.bf16.msra.mxu0 %v1959_v28  ;;  %1056 = vmatpush1.bf16.msra.mxu1 %v2019_v57  ;;  %v2064_v57 = vld [vmem:[#allocation10 + $0x210] ss:$20 sps:$4 sm:$0xff]  }
  0x97   :  { %477 = vmatprep.subr.bf16.mxu0 %v1964_v29  ;;  %1057 = vmatprep.subr.bf16.mxu1 %v2027_v58  ;;  %v2069_v58 = vld [vmem:[#allocation10 + $0x234] ss:$20 sps:$4 sm:$0xff]  }
  0x9a   :  { %478 = vmatpush1.bf16.msra.mxu0 %v1962_v30  ;;  %1058 = vmatpush1.bf16.msra.mxu1 %v2025_v59  ;;  %v1986_v30 = vld [vmem:[#allocation10 + $0x8] ss:$20 sps:$4 sm:$0xff]   ;;  %v2067_v59 = vld [vmem:[#allocation10 + $0x230] ss:$20 sps:$4 sm:$0xff]  }
  0x9b   :  { %479 = vmatprep.subr.bf16.mxu0 %v1967_v31  ;;  %1059 = vmatprep.subr.bf16.mxu1 %v2033_v60  ;;  %v2072_v60 = vld [vmem:[#allocation10 + $0x23c] ss:$20 sps:$4 sm:$0xff]  }
  0x9e   :  { %480 = vmatpush1.bf16.msra.mxu0 %v1965_v32  ;;  %1060 = vmatpush1.bf16.msra.mxu1 %v2031_v61  ;;  %v1994_v32 = vld [vmem:[#allocation10 + $0x34] ss:$20 sps:$4 sm:$0xff]   ;;  %v2070_v61 = vld [vmem:[#allocation10 + $0x238] ss:$20 sps:$4 sm:$0xff]  }
  0x9f   :  { %481 = vmatprep.subr.bf16.mxu0 %v1970_v33  ;;  %1061 = vmatprep.subr.bf16.mxu1 %v2039_v62  ;;  %v1992_v33 = vld [vmem:[#allocation10 + $0x30] ss:$20 sps:$4 sm:$0xff]  }
  0xa0   :  { %v2075_v62 = vld [vmem:[#allocation10 + $0x25c] ss:$20 sps:$4 sm:$0xff]  }
  0xa2   :  { %482 = vmatpush1.bf16.msra.mxu0 %v1968_v34  ;;  %1062 = vmatpush1.bf16.msra.mxu1 %v2037_v63  ;;  %v2000_v34 = vld [vmem:[#allocation10 + $0x5c] ss:$20 sps:$4 sm:$0xff]   ;;  %v2073_v63 = vld [vmem:[#allocation10 + $0x258] ss:$20 sps:$4 sm:$0xff]  }
  0xa3   :  { %483 = vmatprep.subr.bf16.mxu0 %v1973_v35  ;;  %1063 = vmatprep.subr.bf16.mxu1 %v2045_v0  ;;  %v1998_v35 = vld [vmem:[#allocation10 + $0x58] ss:$20 sps:$4 sm:$0xff]  }
  0xa4   :  { %v2078_v0 = vld [vmem:[#allocation10 + $0x264] ss:$20 sps:$4 sm:$0xff]  }
  0xa6   :  { %484 = vmatpush1.bf16.msra.mxu0 %v1971_v36  ;;  %1064 = vmatpush1.bf16.msra.mxu1 %v2043_v1  ;;  %v2006_v36 = vld [vmem:[#allocation10 + $0x84] ss:$20 sps:$4 sm:$0xff]   ;;  %v2076_v1 = vld [vmem:[#allocation10 + $0x260] ss:$20 sps:$4 sm:$0xff]  }
  0xa7   :  { %485 = vmatprep.subr.bf16.mxu0 %v1976_v37  ;;  %1065 = vmatprep.subr.bf16.mxu1 %v2051_v2  ;;  %v2004_v37 = vld [vmem:[#allocation10 + $0x80] ss:$20 sps:$4 sm:$0xff]   ;;  %v2079_v2 = vld [vmem:[#allocation10 + $0x150] ss:$20 sps:$4 sm:$0xff]  }
  0xaa   :  { %486 = vmatpush1.bf16.msra.mxu0 %v1974_v38  ;;  %1066 = vmatpush1.bf16.msra.mxu1 %v2049_v3  ;;  %v2012_v38 = vld [vmem:[#allocation10 + $0xac] ss:$20 sps:$4 sm:$0xff]  }
  0xab   :  { %487 = vmatprep.subr.bf16.mxu0 %v1979_v39  ;;  %1067 = vmatprep.subr.bf16.mxu1 %v2057_v4  ;;  %v2010_v39 = vld [vmem:[#allocation10 + $0xa8] ss:$20 sps:$4 sm:$0xff]   ;;  %v2097_v3 = vld [vmem:[#allocation11 + $0xc0] sm:$0xff]  }
  0xac   :  { %v287_v4 = vld [vmem:[%s2503_s6] sm:$0x3] }
  0xae   :  { %488 = vmatpush1.bf16.msra.mxu0 %v1977_v40  ;;  %1068 = vmatpush1.bf16.msra.mxu1 %v2055_v5  ;;  %v2018_v40 = vld [vmem:[#allocation10 + $0xd4] ss:$20 sps:$4 sm:$0xff]   ;;  %v292_v5 = vrot.slane %v287_v4, %v2459_v10 }
  0xaf   :  { %489 = vmatprep.subr.bf16.mxu0 %v1982_v41  ;;  %1069 = vmatprep.subr.bf16.mxu1 %v2063_v6  ;;  %v2016_v41 = vld [vmem:[#allocation10 + $0xd0] ss:$20 sps:$4 sm:$0xff]   ;;  %v296_v6 = vrot.slane %v287_v4, %v2465_v12 }
  0xb0   :  { %v600_v4 = vld [vmem:[%s2505_s8] sm:$0x1f] }
  0xb2   :  { %490 = vmatpush1.bf16.msra.mxu0 %v1980_v42  ;;  %1070 = vmatpush1.bf16.msra.mxu1 %v2061_v7  ;;  %v2024_v42 = vld [vmem:[#allocation10 + $0xfc] ss:$20 sps:$4 sm:$0xff]  }
  0xb3   :  { %1084 = vmatprep.subr.bf16.mxu0 %v1988_v45  ;;  %v2028_v45 = vld [vmem:[#allocation10 + $0x120] ss:$20 sps:$4 sm:$0xff]   ;;  %1071 = vmatprep.subr.bf16.mxu1 %v2069_v58 }
  0xb4   :  { %v2119_v58 = vld [vmem:[#allocation11 + $0x70] sm:$0xff]  }
  0xb6   :  { %1072 = vmatpush1.bf16.msra.mxu1 %v2067_v59  ;;  %v2120_v59 = vld [vmem:[#allocation11 + $0x30] sm:$0xff]  }
  0xb7   :  { %1073 = vmatprep.subr.bf16.mxu1 %v2075_v62  ;;  %v2123_v62 = vld [vmem:[#allocation11 + $0x78] sm:$0xff]  }
  0xba   :  { %1074 = vmatpush1.bf16.msra.mxu1 %v2073_v63  ;;  %v2124_v63 = vld [vmem:[#allocation11 + $0x38] sm:$0xff]  }
  0xbb   :  { %1819 = vmatprep.subr.bf16.mxu1 %v2079_v2  ;;  %v2312_v2 = vmov 0.0  }
 0x147   :  { %v230_v15 = vpop.f32.mrb[0].mxu1 }
 0x148   :  { %v175_v14 = vpop.f32.mrb[0].mxu0  ;;  %v232_v19 = vpop.f32.mrb[1].mxu1 }
 0x149   :  { %v231_v17 = vadd.f32 %v230_v15, %v175_v14  ;;  %v177_v18 = vpop.f32.mrb[1].mxu0  ;;  %v234_v22 = vpop.f32.mrb[2].mxu1 }
 0x14a   :  { %v233_v20 = vadd.f32 %v232_v19, %v177_v18  ;;  %v179_v21 = vpop.f32.mrb[2].mxu0  ;;  %v235_v25 = vpop.f32.mrb[3].mxu1  ;;  %v2080_v19 = vld [vmem:[#allocation10 + $0x10] ss:$20 sps:$4 sm:$0xff]  }
 0x14b   :  { %v249_v23 = vadd.f32 %v242_v13, %v231_v17  ;;  %v180_v24 = vpop.f32.mrb[3].mxu0  ;;  %v2081_v21 = vld [vmem:[#allocation10 + $0x178] ss:$20 sps:$4 sm:$0xff]   ;;  %v2098_v22 = vld [vmem:[#allocation11 + $0x80] sm:$0xff]  }
 0x14c   :  { %v250_v26 = vadd.f32 %v246_v16, %v233_v20  ;;  %v2082_v24 = vld [vmem:[#allocation10 + $0x38] ss:$20 sps:$4 sm:$0xff]   ;;  %v2083_v25 = vld [vmem:[#allocation10 + $0x1a0] ss:$20 sps:$4 sm:$0xff]  }
 0x14d   :  { %v251_v27 = vmax.f32 %v249_v23, 0.0  ;;  %v2101_v23 = vld [vmem:[#allocation11 + $0xc8] sm:$0xff]  }
 0x14e   :  { %v252_v28 = vmax.f32 %v250_v26, 0.0  ;;  %v2102_v26 = vld [vmem:[#allocation11 + $0x88] sm:$0xff]  }
 0x14f   :  { %v253_v31 = vpack.c.bf16 %v251_v27, %v251_v27  ;;  %v2105_v27 = vld [vmem:[#allocation11 + $0xd0] sm:$0xff]  }
 0x150   :  { %v254_v29 = vpack.c.bf16 %v252_v28, %v252_v28  ;;  %v2084_v28 = vld [vmem:[#allocation10 + $0x60] ss:$20 sps:$4 sm:$0xff]  }
 0x152   :  { %491 = vmatprep.mubr.bf16.mxu0 %v254_v29  ;;  %v2085_v29 = vld [vmem:[#allocation10 + $0x1c8] ss:$20 sps:$4 sm:$0xff]  }
 0x153   :  { %492 = vmatmul.mubr.bf16.vlgmr.msra.gmra.mrb[4].mxu0 %v253_v31  ;;  %v2109_v31 = vld [vmem:[#allocation11 + $0xd8] sm:$0xff]  }
 0x154   :  { %1085 = vmatpush1.bf16.msra.mxu0 %v1986_v30  ;;  %v2106_v30 = vld [vmem:[#allocation11 + $0x90] sm:$0xff]  }
 0x155   :  { %1086 = vmatprep.subr.bf16.mxu0 %v1994_v32  ;;  %v2086_v32 = vld [vmem:[#allocation10 + $0x88] ss:$20 sps:$4 sm:$0xff]  }
 0x158   :  { %1087 = vmatpush1.bf16.msra.mxu0 %v1992_v33  ;;  %v2087_v33 = vld [vmem:[#allocation10 + $0x1f0] ss:$20 sps:$4 sm:$0xff]  }
 0x159   :  { %1088 = vmatprep.subr.bf16.mxu0 %v2000_v34  ;;  %v2110_v34 = vld [vmem:[#allocation11 + $0x98] sm:$0xff]  }
 0x15c   :  { %1089 = vmatpush1.bf16.msra.mxu0 %v1998_v35  ;;  %v2113_v35 = vld [vmem:[#allocation11 + $0xe0] sm:$0xff]  }
 0x15d   :  { %1090 = vmatprep.subr.bf16.mxu0 %v2006_v36  ;;  %v2088_v36 = vld [vmem:[#allocation10 + $0xb0] ss:$20 sps:$4 sm:$0xff]  }
 0x160   :  { %1091 = vmatpush1.bf16.msra.mxu0 %v2004_v37  ;;  %v2089_v37 = vld [vmem:[#allocation10 + $0x218] ss:$20 sps:$4 sm:$0xff]  }
 0x161   :  { %1092 = vmatprep.subr.bf16.mxu0 %v2012_v38  ;;  %v2114_v38 = vld [vmem:[#allocation11 + $0xa0] sm:$0xff]  }
 0x164   :  { %1093 = vmatpush1.bf16.msra.mxu0 %v2010_v39  ;;  %v2117_v39 = vld [vmem:[#allocation11 + $0xe8] sm:$0xff]  }
 0x165   :  { %1094 = vmatprep.subr.bf16.mxu0 %v2018_v40  ;;  %v2090_v40 = vld [vmem:[#allocation10 + $0xd8] ss:$20 sps:$4 sm:$0xff]  }
 0x168   :  { %1095 = vmatpush1.bf16.msra.mxu0 %v2016_v41  ;;  %v2091_v41 = vld [vmem:[#allocation10 + $0x240] ss:$20 sps:$4 sm:$0xff]  }
 0x169   :  { %1096 = vmatprep.subr.bf16.mxu0 %v2024_v42  ;;  %v2118_v42 = vld [vmem:[#allocation11 + $0xa8] sm:$0xff]  }
 0x16c   :  { %1097 = vmatpush1.bf16.msra.mxu0 %v2022_v43  ;;  %v2092_v43 = vld [vmem:[#allocation10 + $0x100] ss:$20 sps:$4 sm:$0xff]  }
 0x16d   :  { %1098 = vmatprep.subr.bf16.mxu0 %v2030_v44  ;;  %v2093_v44 = vld [vmem:[#allocation10 + $0x268] ss:$20 sps:$4 sm:$0xff]  }
 0x170   :  { %1099 = vmatpush1.bf16.msra.mxu0 %v2028_v45  ;;  %v2094_v45 = vld [vmem:[#allocation10 + $0x128] ss:$20 sps:$4 sm:$0xff]  }
 0x171   :  { %1100 = vmatprep.subr.bf16.mxu0 %v2036_v46  ;;  %v2095_v46 = vld [vmem:[#allocation11 + $0x40] sm:$0xff]  }
 0x174   :  { %1101 = vmatpush1.bf16.msra.mxu0 %v2034_v47  ;;  %v2096_v47 = vld [vmem:[#allocation11] sm:$0xff]  }
 0x175   :  { %1102 = vmatprep.subr.bf16.mxu0 %v2042_v48  ;;  %v2099_v48 = vld [vmem:[#allocation11 + $0x48] sm:$0xff]  }
 0x178   :  { %1103 = vmatpush1.bf16.msra.mxu0 %v2040_v49  ;;  %v2100_v49 = vld [vmem:[#allocation11 + $0x8] sm:$0xff]  }
 0x179   :  { %1104 = vmatprep.subr.bf16.mxu0 %v2048_v50  ;;  %v2103_v50 = vld [vmem:[#allocation11 + $0x50] sm:$0xff]  }
 0x17c   :  { %1105 = vmatpush1.bf16.msra.mxu0 %v2046_v51  ;;  %v2104_v51 = vld [vmem:[#allocation11 + $0x10] sm:$0xff]  }
 0x17d   :  { %1106 = vmatprep.subr.bf16.mxu0 %v2054_v52  ;;  %v2107_v52 = vld [vmem:[#allocation11 + $0x58] sm:$0xff]  }
 0x180   :  { %1107 = vmatpush1.bf16.msra.mxu0 %v2052_v53  ;;  %v2108_v53 = vld [vmem:[#allocation11 + $0x18] sm:$0xff]  }
 0x181   :  { %1108 = vmatprep.subr.bf16.mxu0 %v2060_v54  ;;  %v2111_v54 = vld [vmem:[#allocation11 + $0x60] sm:$0xff]  }
 0x184   :  { %1109 = vmatpush1.bf16.msra.mxu0 %v2058_v55  ;;  %v2112_v55 = vld [vmem:[#allocation11 + $0x20] sm:$0xff]  }
 0x185   :  { %1110 = vmatprep.subr.bf16.mxu0 %v2066_v56  ;;  %v2115_v56 = vld [vmem:[#allocation11 + $0x68] sm:$0xff]  }
 0x188   :  { %1111 = vmatpush1.bf16.msra.mxu0 %v2064_v57  ;;  %v2116_v57 = vld [vmem:[#allocation11 + $0x28] sm:$0xff]  }
 0x189   :  { %1112 = vmatprep.subr.bf16.mxu0 %v2072_v60  ;;  %v2121_v60 = vld [vmem:[#allocation11 + $0xf0] sm:$0xff]  }
 0x18c   :  { %1113 = vmatpush1.bf16.msra.mxu0 %v2070_v61  ;;  %v2122_v61 = vld [vmem:[#allocation11 + $0xb0] sm:$0xff]  }
 0x18d   :  { %1114 = vmatprep.subr.bf16.mxu0 %v2078_v0  ;;  %v2125_v0 = vld [vmem:[#allocation11 + $0xf8] sm:$0xff]  }
 0x190   :  { %1115 = vmatpush1.bf16.msra.mxu0 %v2076_v1  ;;  %v2126_v1 = vld [vmem:[#allocation11 + $0xb8] sm:$0xff]  }
 0x191   :  { %1863 = vmatprep.subr.bf16.mxu0 %v2097_v3  ;;  %v612_v3 = vsub.s32 2, %v2456_v9 }
 0x226   :  { %v493_v7 = vpop.f32.mrb[4].mxu0 }
 0x227   :  { %v494_v8 = vadd.f32 %v493_v7, %v292_v5  ;;  %v495_v11 = vpop.f32.mrb[5].mxu0  ;;  %v616_v5 = vsub.s32 3, %v2456_v9  ;;  %v613_v7 = vrot.slane %v600_v4, %v612_v3 }
 0x228   :  { %v496_v13 = vadd.f32 %v495_v11, %v296_v6  ;;  %v497_v14 = vpop.f32.mrb[6].mxu0  ;;  %v605_v6 = vrot.slane %v600_v4, %v2459_v10 }
 0x229   :  { %v500_v15 = vmax.f32 %v494_v8, 0.0  ;;  %v498_v16 = vpop.f32.mrb[7].mxu0  ;;  %v609_v8 = vrot.slane %v600_v4, %v2465_v12  ;;  %v617_v11 = vrot.slane %v600_v4, %v616_v5  ;;  %v2127_v12 = vld [vmem:[#allocation11 + $0x100] sm:$0xff]  }
 0x22a   :  { %v501_v17 = vmax.f32 %v496_v13, 0.0 }
 0x22b   :  { %1638 = vst [vmem:[#allocation13] sm:$0xff] %v500_v15  ;;  %v502_v20 = vpack.c.bf16 %v500_v15, %v500_v15 }
 0x22c   :  { %v503_v18 = vpack.c.bf16 %v501_v17, %v501_v17  ;;  %1639 = vst [vmem:[#allocation13 + $0x8] sm:$0xff] %v501_v17 }
 0x22e   :  { %1075 = vmatprep.mubr.bf16.mxu1 %v503_v18  ;;  %1116 = vmatprep.mubr.bf16.mxu0 %v503_v18 }
 0x22f   :  { %1076 = vmatmul.mubr.bf16.vlgmr.msra.gmra.mrb[4].mxu1 %v502_v20  ;;  %1117 = vmatmul.mubr.bf16.vlgmr.msra.gmra.mrb[8].mxu0 %v502_v20 }
 0x230   :  { %1820 = vmatpush3.bf16.msra.mxu1 %v2080_v19  ;;  %1157 = vmatprep.mubr.bf16.mxu1 %v503_v18 }
 0x231   :  { %1821 = vmatprep.subr.bf16.mxu1 %v2081_v21  ;;  %1864 = vmatpush3.bf16.msra.mxu0 %v2098_v22 }
 0x232   :  { %1865 = vmatprep.subr.bf16.mxu0 %v2101_v23 }
 0x234   :  { %1822 = vmatpush3.bf16.msra.mxu1 %v2082_v24 }
 0x235   :  { %1823 = vmatprep.subr.bf16.mxu1 %v2083_v25  ;;  %1866 = vmatpush3.bf16.msra.mxu0 %v2102_v26 }
 0x236   :  { %1867 = vmatprep.subr.bf16.mxu0 %v2105_v27 }
 0x238   :  { %1824 = vmatpush3.bf16.msra.mxu1 %v2084_v28 }
 0x239   :  { %1825 = vmatprep.subr.bf16.mxu1 %v2085_v29  ;;  %1868 = vmatpush3.bf16.msra.mxu0 %v2106_v30 }
 0x23a   :  { %1869 = vmatprep.subr.bf16.mxu0 %v2109_v31 }
 0x23c   :  { %1826 = vmatpush3.bf16.msra.mxu1 %v2086_v32  ;;  %v2128_v32 = vld [vmem:[#allocation11 + $0x108] sm:$0xff]  }
 0x23d   :  { %1827 = vmatprep.subr.bf16.mxu1 %v2087_v33  ;;  %1870 = vmatpush3.bf16.msra.mxu0 %v2110_v34  ;;  %v2129_v33 = vld [vmem:[#allocation11 + $0x110] sm:$0xff]   ;;  %v2130_v34 = vld [vmem:[#allocation11 + $0x118] sm:$0xff]  }
 0x23e   :  { %1871 = vmatprep.subr.bf16.mxu0 %v2113_v35  ;;  %v2131_v35 = vld [vmem:[#allocation11 + $0x120] sm:$0xff]  }
 0x240   :  { %1828 = vmatpush3.bf16.msra.mxu1 %v2088_v36  ;;  %v2132_v36 = vld [vmem:[#allocation11 + $0x128] sm:$0xff]  }
 0x241   :  { %1829 = vmatprep.subr.bf16.mxu1 %v2089_v37  ;;  %1872 = vmatpush3.bf16.msra.mxu0 %v2114_v38  ;;  %v620_v37 = vsub.s32 4, %v2456_v9  ;;  %v2133_v38 = vld [vmem:[#allocation11 + $0x130] sm:$0xff]   ;;  %v1778_v9 = vld [vmem:[%s2507_s10] ss:$0 sm:$0xff]  ;;  %s2267_s10 = scalar_lea.vmem %s1648_s2, 384 }
 0x242   :  { %1873 = vmatprep.subr.bf16.mxu0 %v2117_v39  ;;  %p2268_p6 = scmp.ne.s32.totalorder %s1648_s2, %s2267_s10  ;;  %p2273_p8 = scmp.lt.s32.totalorder %s2267_s10, %s2267_s10 }
 0x244   :  { %1830 = vmatpush3.bf16.msra.mxu1 %v2090_v40  ;;  %v621_v40 = vrot.slane %v600_v4, %v620_v37  ;;  %p2274_p9 = por %p2273_p8, %p2272_p7 }
 0x245   :  { %1831 = vmatprep.subr.bf16.mxu1 %v2091_v41  ;;  %1874 = vmatpush3.bf16.msra.mxu0 %v2118_v42 }
 0x246   :  { %1875 = vmatprep.subr.bf16.mxu0 %v2121_v60  ;;  %p2275_p10 = pnand %p2274_p9, %p2268_p6 }
 0x248   :  { %1832 = vmatpush3.bf16.msra.mxu1 %v2092_v43 }
 0x249   :  { %1833 = vmatprep.subr.bf16.mxu1 %v2093_v44  ;;  %1876 = vmatpush3.bf16.msra.mxu0 %v2122_v61  ;;  %v2134_v44 = vld [vmem:[#allocation11 + $0x138] sm:$0xff]  }
 0x24a   :  { %1877 = vmatprep.subr.bf16.mxu0 %v2125_v0 }
 0x24c   :  { %1834 = vmatpush3.bf16.msra.mxu1 %v2094_v45 }
 0x24d   :  { %1841 = vmatprep.subr.bf16.mxu1 %v2095_v46  ;;  %1878 = vmatpush3.bf16.msra.mxu0 %v2126_v1 }
 0x24f   :  { %1158 = vmatmul.mubr.bf16.vlgmr.msra.gmra.mrb[8].mxu1 %v502_v20 }
 0x250   :  { %1842 = vmatpush3.bf16.msra.mxu1 %v2096_v47 }
 0x251   :  { %1843 = vmatprep.subr.bf16.mxu1 %v2099_v48 }
 0x254   :  { %1844 = vmatpush3.bf16.msra.mxu1 %v2100_v49 }
 0x255   :  { %1845 = vmatprep.subr.bf16.mxu1 %v2103_v50 }
 0x258   :  { %1846 = vmatpush3.bf16.msra.mxu1 %v2104_v51 }
 0x259   :  { %1847 = vmatprep.subr.bf16.mxu1 %v2107_v52 }
 0x25c   :  { %1848 = vmatpush3.bf16.msra.mxu1 %v2108_v53 }
 0x25d   :  { %1849 = vmatprep.subr.bf16.mxu1 %v2111_v54 }
 0x260   :  { %1850 = vmatpush3.bf16.msra.mxu1 %v2112_v55 }
 0x261   :  { %1851 = vmatprep.subr.bf16.mxu1 %v2115_v56 }
 0x264   :  { %1852 = vmatpush3.bf16.msra.mxu1 %v2116_v57 }
 0x265   :  { %1853 = vmatprep.subr.bf16.mxu1 %v2119_v58 }
 0x268   :  { %1854 = vmatpush3.bf16.msra.mxu1 %v2120_v59 }
 0x269   :  { %1855 = vmatprep.subr.bf16.mxu1 %v2123_v62 }
 0x26c   :  { %1856 = vmatpush3.bf16.msra.mxu1 %v2124_v63 }
 0x26d   :  { %1894 = vmatprep.subr.bf16.mxu1 %v2312_v2 }
 0x302   :  { %v1077_v13 = vpop.f32.mrb[4].mxu1  ;;  %v1118_v14 = vpop.f32.mrb[8].mxu0 }
 0x303   :  { %v1078_v15 = vadd.f32 %v1077_v13, %v605_v6  ;;  %v1119_v16 = vadd.f32 %v1118_v14, %v613_v7  ;;  %v1079_v17 = vpop.f32.mrb[5].mxu1  ;;  %v1120_v18 = vpop.f32.mrb[9].mxu0 }
 0x304   :  { %v1080_v19 = vadd.f32 %v1079_v17, %v609_v8  ;;  %v1121_v20 = vadd.f32 %v1120_v18, %v617_v11  ;;  %v1081_v21 = vpop.f32.mrb[6].mxu1  ;;  %v1122_v22 = vpop.f32.mrb[10].mxu0 }
 0x305   :  { %v1176_v23 = vmax.f32 %v1078_v15, 0.0  ;;  %v1178_v24 = vmax.f32 %v1119_v16, 0.0  ;;  %v1082_v25 = vpop.f32.mrb[7].mxu1  ;;  %v1123_v26 = vpop.f32.mrb[11].mxu0 }
 0x306   :  { %v1177_v27 = vmax.f32 %v1080_v19, 0.0  ;;  %v1179_v10 = vmax.f32 %v1121_v20, 0.0 }
 0x307   :  { %v1186_v30 = vpack.c.bf16 %v1176_v23, %v1176_v23  ;;  %v1188_v31 = vpack.c.bf16 %v1178_v24, %v1178_v24 }
 0x308   :  { %v1187_v28 = vpack.c.bf16 %v1177_v27, %v1177_v27  ;;  %v1189_v29 = vpack.c.bf16 %v1179_v10, %v1179_v10 }
 0x30a   :  { %1550 = vmatprep.mubr.bf16.mxu1 %v1187_v28  ;;  %1590 = vmatprep.mubr.bf16.mxu0 %v1189_v29 }
 0x30b   :  { %1551 = vmatmul.mubr.bf16.vlgmr.msra.gmra.mrb[12].mxu1 %v1186_v30  ;;  %1591 = vmatmul.mubr.bf16.vlgmr.msra.gmra.mrb[12].mxu0 %v1188_v31 }
 0x30c   :  { %1895 = vmatpush3.bf16.msra.mxu1 %v2127_v12  ;;  %1910 = vmatprep.mubr.msk.bf16.mxu1 %vm2313_vm3, %v2312_v2 }
 0x30d   :  { %1896 = vmatprep.subr.bf16.mxu1 %v2312_v2 }
 0x310   :  { %1897 = vmatpush3.bf16.msra.mxu1 %v2128_v32 }
 0x311   :  { %1898 = vmatprep.subr.bf16.mxu1 %v2312_v2 }
 0x314   :  { %1899 = vmatpush3.bf16.msra.mxu1 %v2129_v33 }
 0x315   :  { %1900 = vmatprep.subr.bf16.mxu1 %v2312_v2 }
 0x318   :  { %1901 = vmatpush3.bf16.msra.mxu1 %v2130_v34 }
 0x319   :  { %1902 = vmatprep.subr.bf16.mxu1 %v2312_v2 }
 0x31c   :  { %1903 = vmatpush3.bf16.msra.mxu1 %v2131_v35 }
 0x31d   :  { %1904 = vmatprep.subr.bf16.mxu1 %v2312_v2 }
 0x320   :  { %1905 = vmatpush3.bf16.msra.mxu1 %v2132_v36 }
 0x321   :  { %1906 = vmatprep.subr.bf16.mxu1 %v2312_v2 }
 0x322   :  { %v1835_v39 = vpop.f32.mrb[8].mxu1 }
 0x323   :  { %v1836_v41 = vpop.f32.mrb[9].mxu1 }
 0x324   :  { %v1837_v42 = vadd.f32 %v1836_v41, %v1835_v39  ;;  %v1838_v43 = vpop.f32.mrb[10].mxu1  ;;  %1907 = vmatpush3.bf16.msra.mxu1 %v2133_v38 }
 0x325   :  { %v1839_v45 = vpop.f32.mrb[11].mxu1  ;;  %1908 = vmatprep.subr.bf16.mxu1 %v2312_v2 }
 0x326   :  { %v1160_v46 = vadd.f32 %v1837_v42, %v621_v40 }
 0x328   :  { %v1190_v47 = vpack.c.bf16 %v1160_v46, %v1160_v46  ;;  %1909 = vmatpush3.bf16.msra.mxu1 %v2134_v44 }
 0x32b   :  { %1911 = vmatmul.mubr.bf16.vlgmr.msra.gmra.mrb[16].mxu1 %v1190_v47 }
 0x3de   :  { %v1857_v48 = vpop.f32.mrb[12].mxu1  ;;  %v1879_v49 = vpop.f32.mrb[12].mxu0 }
 0x3df   :  { %v1858_v50 = vpop.f32.mrb[13].mxu1  ;;  %v1880_v51 = vpop.f32.mrb[13].mxu0 }
 0x3e0   :  { %v1859_v52 = vadd.f32 %v1858_v50, %v1857_v48  ;;  %v1881_v53 = vadd.f32 %v1880_v51, %v1879_v49  ;;  %v1860_v54 = vpop.f32.mrb[14].mxu1  ;;  %v1882_v55 = vpop.f32.mrb[14].mxu0 }
 0x3e1   :  { %v1861_v56 = vpop.f32.mrb[15].mxu1  ;;  %v1883_v57 = vpop.f32.mrb[15].mxu0 }
 0x3e2   :  { %v1553_v58 = vadd.f32 %v1859_v52, %v1778_v9 }
 0x3e4   :  { %v1593_v59 = vadd.f32 %v1881_v53, %v1553_v58 }
 0x3fe   :  { %v1632_v60 = vpop.f32.mrb[16].mxu1 }
 0x3ff   :  { %v1633_v61 = vadd.f32 %v1632_v60, %v1593_v59  ;;  %v1912_v62 = vpop.f32.mrb[17].mxu1 }
 0x400   :  { %v1635_v63 = vpop.f32.mrb[18].mxu1 }
 0x401   :  { %1640 = vst [vmem:[#allocation13 + $0x10] sm:$0xff] %v1633_v61  ;;  %v1913_v0 = vpop.f32.mrb[19].mxu1 }
 0x402   :  { %2278 = shalt.err (!%p2275_p10)
}
 0x403   :  { %s2279_s17 = scalar_lea.hbm %s2508_s11, 384 }
 0x404   :  { %p2280_p11 = scmp.ne.s32.totalorder %s2508_s11, %s2279_s17  ;;  %p2283_p12 = scmp.lt.u32.totalorder %s2279_s17, %s2508_s11 }
 0x406   :  { %p2285_p13 = pnand %p2283_p12, %p2280_p11 }
 0x408   :  { %2288 = shalt.err (!%p2285_p13)
}
 0x409   :  { %1650 = dma.vmem_to_hbm [thread:$0]  %s1648_s2, 384, %s2508_s11, [#allocation4]  }
 0x40a   :  { %2297 = dma.done.wait [#allocation4], 384  }
 0x40b   :  { %2298 = vsyncadd [#allocation4], 4294966912 }
 0x40c   :  { %1654 = vsyncpa [#allocation3], 1 }
 0x40d   :  { %1655 = vsyncpa [#allocation6], 1 }
 0x40e   :  { %1656 = vsyncpa [#allocation9], 1 }
 0x40f   :  { %1657 = vsyncpa [#allocation12], 1 }
 0x410   :  { %1658 = vsyncpa [#allocation4], 1 }

</bundles_post_ra>
